<compile_context>
chip_gen: v7x
topology: tpu7x:2x2x1
jax: 0.10.0
libtpu: 0.0.40
codegen_flags: <defaults>
</compile_context>

<pallas_src>
import jax
import jax.numpy as jnp
from jax.experimental import pallas as pl
from jax.experimental.pallas import tpu as pltpu

LANES = 128
SUBLANES = 8


def _round_up(n, m):
    return ((n + m - 1) // m) * m


def _default_grid_steps():
    # v7x has 2 TensorCores per chip -> shard the batch across both cores;
    # v5e/v6e have 1 TC, where extra grid steps are pure pipeline overhead.
    try:
        kind = jax.devices()[0].device_kind.lower()
        if "v7" in kind or "7x" in kind:
            return 2
    except Exception:
        pass
    return 1


def tgrl_kernel(x_ref, wc_ref, bc_ref, wfc_ref, bfc_ref, out_ref):
    # x_ref  : (Bblk, I)
    # wc_ref : (I, 4L)     bc_ref : (1, 4L)   (fused GCN + LSTM-ih weights/bias)
    # wfc_ref: (L, Cp)     bfc_ref: (1, Cp)   (classifier, lane-padded to Cp)
    # out_ref: (Bblk, Cp)
    gates = jnp.dot(x_ref[...], wc_ref[...],
                    preferred_element_type=jnp.float32) + bc_ref[...]   # (Bblk, 4L)
    L = gates.shape[-1] // 4
    i_g = jax.nn.sigmoid(gates[:, 0 * L:1 * L])
    # forget gate is dead: c0 == 0  =>  f * c0 == 0
    g_g = jnp.tanh(gates[:, 2 * L:3 * L])
    o_g = jax.nn.sigmoid(gates[:, 3 * L:4 * L])
    h1 = o_g * jnp.tanh(i_g * g_g)                                      # (Bblk, L)

    out = jnp.dot(h1.astype(wfc_ref.dtype), wfc_ref[...],
                  preferred_element_type=jnp.float32) + bfc_ref[...]    # (Bblk, Cp)
    out_ref[...] = out.astype(out_ref.dtype)


def prepare_params(w_gcn, b_gcn, w_ih, b_ih, w_hh, b_hh, w_fc, b_fc,
                   *, weight_dtype=jnp.float32):
    """One-time weight preparation, hoisted out of the per-call path.

    Valid for the module's forward pass: default zero LSTM initial state and
    a length-1 sequence, so the W_hh term and the forget-gate term vanish.
    """
    del w_hh  # only multiplies the zero initial hidden state
    L = w_ih.shape[0] // 4
    C = w_fc.shape[0]
    Cp = _round_up(max(C, LANES), LANES)          # lane-dense classifier width

    # Fuse GCN linear into the LSTM input projection (exact up to rounding).
    wc = w_gcn.T.astype(jnp.float32) @ w_ih.T.astype(jnp.float32)       # (I, 4L)
    bc = b_gcn.astype(jnp.float32) @ w_ih.T.astype(jnp.float32) \
        + b_ih.astype(jnp.float32) + b_hh.astype(jnp.float32)           # (4L,)

    wfc = jnp.zeros((L, Cp), weight_dtype).at[:, :C].set(
        w_fc.T.astype(weight_dtype))
    bfc = jnp.zeros((1, Cp), jnp.float32).at[:, :C].set(
        b_fc.astype(jnp.float32))

    return dict(
        wc=wc.astype(weight_dtype),
        bc=bc.reshape(1, 4 * L).astype(jnp.float32),
        wfc=wfc,
        bfc=bfc,
        num_classes=C,
    )


def tgrl_forward(input_graphs, srl_embeddings, params, *,
                 block_b=None, grid_steps=None):
    """input_graphs: (B, input_size). Returns (B, num_classes) float32."""
    # srl_embeddings is accepted for API parity with the torch module but is
    # unused by its forward pass.
    del srl_embeddings

    wc, bc = params["wc"], params["bc"]
    wfc, bfc = params["wfc"], params["bfc"]
    C = params["num_classes"]

    B, I = input_graphs.shape
    G4 = wc.shape[1]
    L, Cp = wfc.shape

    if grid_steps is None:
        grid_steps = _default_grid_steps()
    if block_b is None:
        Bblk = _round_up(pl.cdiv(B, grid_steps), SUBLANES)
    else:
        # Robust against non-multiple-of-8 user block sizes.
        Bblk = _round_up(min(block_b, B), SUBLANES)
    Bpad = _round_up(B, Bblk)
    steps = Bpad // Bblk

    x = input_graphs.astype(wc.dtype)
    if Bpad != B:
        x = jnp.pad(x, ((0, Bpad - B), (0, 0)))

    out = pl.pallas_call(
        tgrl_kernel,
        out_shape=jax.ShapeDtypeStruct((Bpad, Cp), jnp.float32),
        grid_spec=pltpu.PrefetchScalarGridSpec(
            num_scalar_prefetch=0,
            grid=(steps,),
            in_specs=[
                pl.BlockSpec((Bblk, I), lambda b: (b, 0)),
                pl.BlockSpec((I, G4), lambda b: (0, 0)),
                pl.BlockSpec((1, G4), lambda b: (0, 0)),
                pl.BlockSpec((L, Cp), lambda b: (0, 0)),
                pl.BlockSpec((1, Cp), lambda b: (0, 0)),
            ],
            out_specs=pl.BlockSpec((Bblk, Cp), lambda b: (b, 0)),
        ),
        compiler_params=pltpu.CompilerParams(
            dimension_semantics=("parallel",)),
    )(x, wc, bc, wfc, bfc)

    return out[:B, :C]


def reference(x, w_gcn, b_gcn, w_ih, b_ih, w_hh, b_hh, w_fc, b_fc):
    """Pure-JAX reference matching torch semantics (h0 = c0 = 0, seq_len = 1)."""
    h = x @ w_gcn.T + b_gcn
    gates = h @ w_ih.T + b_ih + b_hh              # h0 == 0 -> W_hh term vanishes
    L = w_ih.shape[0] // 4
    i = jax.nn.sigmoid(gates[:, 0 * L:1 * L])
    g = jnp.tanh(gates[:, 2 * L:3 * L])
    o = jax.nn.sigmoid(gates[:, 3 * L:4 * L])
    c1 = i * g                                    # c0 == 0 -> forget-gate term vanishes
    h1 = o * jnp.tanh(c1)
    return h1 @ w_fc.T + b_fc


if __name__ == "__main__":
    # input_size=32, hidden_size=64, lstm_hidden_size=32, num_classes=8
    B, I, H, L, C = 50, 32, 64, 32, 8

    key = jax.random.PRNGKey(0)
    ks = jax.random.split(key, 10)

    x = jax.random.normal(ks[0], (B, I), dtype=jnp.float32)
    srl = jax.random.normal(ks[1], (B, 16), dtype=jnp.float32)   # unused by the module

    lim_g = 1.0 / jnp.sqrt(I)
    w_gcn = jax.random.uniform(ks[2], (H, I), minval=-lim_g, maxval=lim_g, dtype=jnp.float32)
    b_gcn = jax.random.uniform(ks[3], (H,), minval=-lim_g, maxval=lim_g, dtype=jnp.float32)

    lim_l = 1.0 / jnp.sqrt(L)
    w_ih = jax.random.uniform(ks[4], (4 * L, H), minval=-lim_l, maxval=lim_l, dtype=jnp.float32)
    b_ih = jax.random.uniform(ks[5], (4 * L,), minval=-lim_l, maxval=lim_l, dtype=jnp.float32)
    w_hh = jax.random.uniform(ks[6], (4 * L, L), minval=-lim_l, maxval=lim_l, dtype=jnp.float32)
    b_hh = jax.random.uniform(ks[7], (4 * L,), minval=-lim_l, maxval=lim_l, dtype=jnp.float32)

    lim_f = 1.0 / jnp.sqrt(L)
    w_fc = jax.random.uniform(ks[8], (C, L), minval=-lim_f, maxval=lim_f, dtype=jnp.float32)
    b_fc = jax.random.uniform(ks[9], (C,), minval=-lim_f, maxval=lim_f, dtype=jnp.float32)

    # One-time weight prep (fusion, transposes, lane padding) -- hoisted.
    params = prepare_params(w_gcn, b_gcn, w_ih, b_ih, w_hh, b_hh, w_fc, b_fc)

    out = tgrl_forward(x, srl, params)            # grid auto-sized per chip
    out = jax.block_until_ready(out)

    ref = reference(x, w_gcn, b_gcn, w_ih, b_ih, w_hh, b_hh, w_fc, b_fc)
    assert out.shape == (B, C), out.shape
    err = float(jnp.max(jnp.abs(out - ref)))
    assert jnp.allclose(out, ref, atol=1e-5, rtol=1e-5), err

    print("KERNEL_OK")
</pallas_src>

<mosaic_0001>
module attributes {stable_mosaic.version = 11 : i64} {
  func.func @tgrl_kernel(%arg0: i32, %arg1: memref<56x32xf32, #tpu.memory_space<vmem>>, %arg2: memref<32x128xf32, #tpu.memory_space<vmem>>, %arg3: memref<1x128xf32, #tpu.memory_space<vmem>>, %arg4: memref<32x128xf32, #tpu.memory_space<vmem>>, %arg5: memref<1x128xf32, #tpu.memory_space<vmem>>, %arg6: memref<56x128xf32, #tpu.memory_space<vmem>>) attributes {dimension_semantics = [#tpu.dimension_semantics<parallel>], iteration_bounds = array<i64: 1>, scalar_prefetch = 0 : i64, scratch_operands = 0 : i64, tpu.core_type = #tpu.core_type<tc>, window_params = [{transform_indices = @transform_0, window_bounds = array<i64: 56, 32>}, {pipeline_mode = #tpu.pipeline_mode<synchronous>, transform_indices = @transform_1, window_bounds = array<i64: 32, 128>}, {pipeline_mode = #tpu.pipeline_mode<synchronous>, transform_indices = @transform_2, window_bounds = array<i64: 1, 128>}, {pipeline_mode = #tpu.pipeline_mode<synchronous>, transform_indices = @transform_3, window_bounds = array<i64: 32, 128>}, {pipeline_mode = #tpu.pipeline_mode<synchronous>, transform_indices = @transform_4, window_bounds = array<i64: 1, 128>}, {transform_indices = @transform_5, window_bounds = array<i64: 56, 128>}]} {
    %c0 = arith.constant 0 : index
    %c0_0 = arith.constant 0 : index
    %0 = vector.load %arg1[%c0, %c0_0] : memref<56x32xf32, #tpu.memory_space<vmem>>, vector<56x32xf32>
    %c0_1 = arith.constant 0 : index
    %c0_2 = arith.constant 0 : index
    %1 = vector.load %arg2[%c0_1, %c0_2] : memref<32x128xf32, #tpu.memory_space<vmem>>, vector<32x128xf32>
    %cst = arith.constant dense<0.000000e+00> : vector<56x128xf32>
    %2 = tpu.matmul %0, %1, %cst {dimension_numbers = #tpu.dot_dimension_numbers<[1], [0], [0], [1], [0, 0, 1, 1], [], []>} : vector<56x32xf32>, vector<32x128xf32>, vector<56x128xf32> -> vector<56x128xf32>
    %c0_3 = arith.constant 0 : index
    %c0_4 = arith.constant 0 : index
    %3 = vector.load %arg3[%c0_3, %c0_4] : memref<1x128xf32, #tpu.memory_space<vmem>>, vector<1x128xf32>
    %4 = vector.broadcast %3 : vector<1x128xf32> to vector<56x128xf32>
    %5 = arith.addf %2, %4 : vector<56x128xf32>
    %6 = vector.extract_strided_slice %5 {offsets = [0, 0], sizes = [56, 32], strides = [1, 1]} : vector<56x128xf32> to vector<56x32xf32>
    %7 = arith.negf %6 : vector<56x32xf32>
    %8 = math.exp %7 : vector<56x32xf32>
    %cst_5 = arith.constant 1.000000e+00 : f32
    %9 = vector.broadcast %cst_5 : f32 to vector<56x32xf32>
    %10 = arith.addf %9, %8 : vector<56x32xf32>
    %11 = arith.divf %9, %10 : vector<56x32xf32>
    %12 = vector.extract_strided_slice %5 {offsets = [0, 64], sizes = [56, 32], strides = [1, 1]} : vector<56x128xf32> to vector<56x32xf32>
    %13 = math.tanh %12 : vector<56x32xf32>
    %14 = vector.extract_strided_slice %5 {offsets = [0, 96], sizes = [56, 32], strides = [1, 1]} : vector<56x128xf32> to vector<56x32xf32>
    %15 = arith.negf %14 : vector<56x32xf32>
    %16 = math.exp %15 : vector<56x32xf32>
    %cst_6 = arith.constant 1.000000e+00 : f32
    %17 = vector.broadcast %cst_6 : f32 to vector<56x32xf32>
    %18 = arith.addf %17, %16 : vector<56x32xf32>
    %19 = arith.divf %17, %18 : vector<56x32xf32>
    %20 = arith.mulf %11, %13 : vector<56x32xf32>
    %21 = math.tanh %20 : vector<56x32xf32>
    %22 = arith.mulf %19, %21 : vector<56x32xf32>
    %c0_7 = arith.constant 0 : index
    %c0_8 = arith.constant 0 : index
    %23 = vector.load %arg4[%c0_7, %c0_8] : memref<32x128xf32, #tpu.memory_space<vmem>>, vector<32x128xf32>
    %cst_9 = arith.constant dense<0.000000e+00> : vector<56x128xf32>
    %24 = tpu.matmul %22, %23, %cst_9 {dimension_numbers = #tpu.dot_dimension_numbers<[1], [0], [0], [1], [0, 0, 1, 1], [], []>} : vector<56x32xf32>, vector<32x128xf32>, vector<56x128xf32> -> vector<56x128xf32>
    %c0_10 = arith.constant 0 : index
    %c0_11 = arith.constant 0 : index
    %25 = vector.load %arg5[%c0_10, %c0_11] : memref<1x128xf32, #tpu.memory_space<vmem>>, vector<1x128xf32>
    %26 = vector.broadcast %25 : vector<1x128xf32> to vector<56x128xf32>
    %27 = arith.addf %24, %26 : vector<56x128xf32>
    %c0_12 = arith.constant 0 : index
    %c0_13 = arith.constant 0 : index
    %28 = vector.load %arg6[%c0_12, %c0_13] : memref<56x128xf32, #tpu.memory_space<vmem>>, vector<56x128xf32>
    tpu.vector_store %arg6[%c0_12, %c0_13], %27 {strides = array<i32>} : memref<56x128xf32, #tpu.memory_space<vmem>>, vector<56x128xf32>,
    return
  }
  func.func @transform_0(%arg0: i32) -> (i32, i32) {
    %c0_i32 = arith.constant 0 : i32
    %c0_i32_0 = arith.constant 0 : i32
    return %arg0, %c0_i32 : i32, i32
  }
  func.func @transform_1(%arg0: i32) -> (i32, i32) {
    %c0_i32 = arith.constant 0 : i32
    %c0_i32_0 = arith.constant 0 : i32
    %c0_i32_1 = arith.constant 0 : i32
    return %c0_i32, %c0_i32_0 : i32, i32
  }
  func.func @transform_2(%arg0: i32) -> (i32, i32) {
    %c0_i32 = arith.constant 0 : i32
    %c0_i32_0 = arith.constant 0 : i32
    %c0_i32_1 = arith.constant 0 : i32
    return %c0_i32, %c0_i32_0 : i32, i32
  }
  func.func @transform_3(%arg0: i32) -> (i32, i32) {
    %c0_i32 = arith.constant 0 : i32
    %c0_i32_0 = arith.constant 0 : i32
    %c0_i32_1 = arith.constant 0 : i32
    return %c0_i32, %c0_i32_0 : i32, i32
  }
  func.func @transform_4(%arg0: i32) -> (i32, i32) {
    %c0_i32 = arith.constant 0 : i32
    %c0_i32_0 = arith.constant 0 : i32
    %c0_i32_1 = arith.constant 0 : i32
    return %c0_i32, %c0_i32_0 : i32, i32
  }
  func.func @transform_5(%arg0: i32) -> (i32, i32) {
    %c0_i32 = arith.constant 0 : i32
    %c0_i32_0 = arith.constant 0 : i32
    return %arg0, %c0_i32 : i32, i32
  }
}

</mosaic_0001>

<bundles_post_ra>
// kernel: tpu_custom_call.1
= control target key start
LH: loop header
LB: loop body
LE: loop exit
PB: predicated region body
PF: predicated region fallthrough
CT: control target
= control target key end

     0   :  { %v660_v3 = vmov 0.0|0.0   ;;  %vm661_vm0 = vmmov 0   ;;  %v662_v6 = vmov 0.0   ;;  %s815_s0 = inlined_call_operand.vmem [shape: f32[56,32], index: 0, kind: input, shape index: {}]   ;;  %s816_s1 = inlined_call_operand.vmem [shape: f32[32,128], index: 1, kind: input, shape index: {}]   ;;  %s817_s2 = inlined_call_operand.vmem [shape: f32[1,128], index: 2, kind: input, shape index: {}]   ;;  %s818_s3 = inlined_call_operand.vmem [shape: f32[32,128], index: 3, kind: input, shape index: {}]   ;;  %s819_s4 = inlined_call_operand.vmem [shape: f32[1,128], index: 4, kind: input, shape index: {}]   ;;  %s820_s5 = inlined_call_operand.hbm [shape: f32[56,128], index: 5, kind: output, shape index: {}]  }
   0x1   :  { %v28_v0 = vld [vmem:[%s816_s1] sm:$0xff]  ;;  %v29_v1 = vld [vmem:[%s816_s1 + $0x8] sm:$0xff]  ;;  %v30_v2 = vld [vmem:[%s816_s1 + $0x10] sm:$0xff]  ;;  %559 = vmatprep.subr.bf16.mxu0 %v660_v3  ;;  %509 = vmatprep.mubr.msk.f32.mxu0 %vm661_vm0, %v662_v6 }
   0x2   :  { %v560_v4 = vpack.c.bf16 %v29_v1, %v28_v0  ;;  %v31_v5 = vld [vmem:[%s816_s1 + $0x18] sm:$0xff]  ;;  %565 = vmatprep.subr.bf16.mxu1 %v660_v3  ;;  %538 = vmatprep.mubr.msk.f32.mxu1 %vm661_vm0, %v662_v6 }
   0x3   :  { %v563_v7 = vpack.c.bf16 %v31_v5, %v30_v2 }
   0x4   :  { %561 = vmatpush3.bf16.msra.mxu0 %v560_v4 }
   0x5   :  { %562 = vmatprep.subr.bf16.mxu0 %v660_v3 }
   0x6   :  { %10 = vsyncpa [#allocation3], 0  ;;  %v21_v8 = vld [vmem:[%s815_s0] sm:$0xff]  ;;  %vm39_vm1 = vcmask 261120   ;;  %v22_v9 = vld [vmem:[%s815_s0 + $0x8] sm:$0xff]  ;;  %s665_s24 = smov 32  }
   0x7   :  { %v23_v10 = vld [vmem:[%s815_s0 + $0x10] sm:$0xff]  ;;  %v24_v11 = vld [vmem:[%s815_s0 + $0x18] sm:$0xff]  ;;  %v25_v12 = vld [vmem:[%s815_s0 + $0x20] sm:$0xff] }
   0x8   :  { %564 = vmatpush3.bf16.msra.mxu0 %v563_v7  ;;  %v26_v13 = vld [vmem:[%s815_s0 + $0x28] sm:$0xff]  ;;  %v27_v14 = vld [vmem:[%s815_s0 + $0x30] sm:$0xff]  ;;  %v456_v15 = vld [vmem:[%s817_s2] ss:$0 sm:$0xff]  ;;  %s663_s0 = smov 64   ;;  %s664_s2 = smov 96  }
   0xb   :  { %510 = vmatmul.mubr.msk.f32.vlgmr.msra.gmra.mrb[0].mxu0 %vm39_vm1, %v21_v8 }
   0xc   :  { %512 = vmatprep.mubr.msk.f32.mxu0 %vm661_vm0, %v662_v6 }
   0xf   :  { %513 = vmatmul.mubr.msk.f32.gmra.mrb[2].mxu0 %vm39_vm1, %v22_v9 }
  0x10   :  { %515 = vmatprep.mubr.msk.f32.mxu0 %vm661_vm0, %v662_v6 }
  0x13   :  { %516 = vmatmul.mubr.msk.f32.gmra.mrb[4].mxu0 %vm39_vm1, %v23_v10 }
  0x14   :  { %518 = vmatprep.mubr.msk.f32.mxu0 %vm661_vm0, %v662_v6 }
  0x17   :  { %519 = vmatmul.mubr.msk.f32.gmra.mrb[6].mxu0 %vm39_vm1, %v24_v11 }
  0x18   :  { %521 = vmatprep.mubr.msk.f32.mxu0 %vm661_vm0, %v662_v6 }
  0x1b   :  { %522 = vmatmul.mubr.msk.f32.gmra.mrb[8].mxu0 %vm39_vm1, %v25_v12 }
  0x1c   :  { %524 = vmatprep.mubr.msk.f32.mxu0 %vm661_vm0, %v662_v6 }
  0x1f   :  { %525 = vmatmul.mubr.msk.f32.gmra.mrb[10].mxu0 %vm39_vm1, %v26_v13 }
  0x20   :  { %527 = vmatprep.mubr.msk.f32.mxu0 %vm661_vm0, %v662_v6 }
  0x23   :  { %528 = vmatmul.mubr.msk.f32.gmra.mrb[12].mxu0 %vm39_vm1, %v27_v14 }
  0xde   :  { %v127_v16 = vpop.f32.mrb[0].mxu0 }
  0xdf   :  { %v128_v17 = vadd.f32 %v456_v15, %v127_v16  ;;  %v511_v18 = vpop.f32.mrb[1].mxu0 }
  0xe1   :  { %580 = vtanh.f32 %v128_v17  ;;  %v464_v44 = vmul.f32 -1.442695, %v128_v17 }
  0xe2   :  { %v132_v19 = vpop.f32.mrb[2].mxu0 }
  0xe3   :  { %v133_v20 = vadd.f32 %v456_v15, %v132_v19  ;;  %v514_v21 = vpop.f32.mrb[3].mxu0 }
  0xe5   :  { %582 = vtanh.f32 %v133_v20  ;;  %v465_v45 = vmul.f32 -1.442695, %v133_v20 }
  0xe6   :  { %v137_v22 = vpop.f32.mrb[4].mxu0 }
  0xe7   :  { %v138_v23 = vadd.f32 %v456_v15, %v137_v22  ;;  %v517_v24 = vpop.f32.mrb[5].mxu0 }
  0xe9   :  { %584 = vtanh.f32 %v138_v23  ;;  %v466_v46 = vmul.f32 -1.442695, %v138_v23 }
  0xea   :  { %v142_v25 = vpop.f32.mrb[6].mxu0 }
  0xeb   :  { %v581_v26 = vpop.eup %580  ;;  %v143_v27 = vadd.f32 %v456_v15, %v142_v25  ;;  %v520_v28 = vpop.f32.mrb[7].mxu0 }
  0xec   :  { %217 = vrot.lane.b32.xlu0 %v581_v26, %s663_s0  ;;  %v287_v28 = vld [vmem:[%s818_s3] sm:$0xff] }
  0xed   :  { %586 = vtanh.f32 %v143_v27  ;;  %v467_v47 = vmul.f32 -1.442695, %v143_v27 }
  0xee   :  { %v147_v29 = vpop.f32.mrb[8].mxu0 }
  0xef   :  { %v583_v30 = vpop.eup %582  ;;  %v148_v31 = vadd.f32 %v456_v15, %v147_v29  ;;  %v523_v32 = vpop.f32.mrb[9].mxu0  ;;  %v288_v29 = vld [vmem:[%s818_s3 + $0x8] sm:$0xff] }
  0xf0   :  { %219 = vrot.lane.b32.xlu0 %v583_v30, %s663_s0  ;;  %v289_v30 = vld [vmem:[%s818_s3 + $0x10] sm:$0xff]  ;;  %v290_v32 = vld [vmem:[%s818_s3 + $0x18] sm:$0xff] }
  0xf1   :  { %588 = vtanh.f32 %v148_v31  ;;  %v468_v49 = vmul.f32 -1.442695, %v148_v31  ;;  %v566_v31 = vpack.c.bf16 %v288_v29, %v287_v28 }
  0xf2   :  { %v152_v33 = vpop.f32.mrb[10].mxu0 }
  0xf3   :  { %v585_v34 = vpop.eup %584  ;;  %v153_v35 = vadd.f32 %v456_v15, %v152_v33  ;;  %v526_v36 = vpop.f32.mrb[11].mxu0  ;;  %567 = vmatpush3.bf16.msra.mxu1 %v566_v31 }
  0xf4   :  { %221 = vrot.lane.b32.xlu1 %v585_v34, %s663_s0  ;;  %v569_v34 = vpack.c.bf16 %v290_v32, %v289_v30  ;;  %568 = vmatprep.subr.bf16.mxu1 %v660_v3 }
  0xf5   :  { %590 = vtanh.f32 %v153_v35  ;;  %v469_v52 = vmul.f32 -1.442695, %v153_v35 }
  0xf6   :  { %v157_v37 = vpop.f32.mrb[12].mxu0 }
  0xf7   :  { %v587_v38 = vpop.eup %586  ;;  %v158_v39 = vadd.f32 %v456_v15, %v157_v37  ;;  %v529_v40 = vpop.f32.mrb[13].mxu0  ;;  %570 = vmatpush3.bf16.msra.mxu1 %v569_v34 }
  0xf8   :  { %223 = vrot.lane.b32.xlu1 %v587_v38, %s663_s0 }
  0xf9   :  { %592 = vtanh.f32 %v158_v39  ;;  %v470_v55 = vmul.f32 -1.442695, %v158_v39 }
  0xfa   :  { %594 = vpow2.f32 %v464_v44 }
  0xfb   :  { %v589_v41 = vpop.eup %588  ;;  %596 = vpow2.f32 %v465_v45 }
  0xfc   :  { %225 = vrot.lane.b32.xlu0 %v589_v41, %s663_s0  ;;  %598 = vpow2.f32 %v466_v46 }
  0xfd   :  { %600 = vpow2.f32 %v467_v47 }
  0xfe   :  { %602 = vpow2.f32 %v468_v49 }
  0xff   :  { %v591_v42 = vpop.eup %590 }
 0x100   :  { %227 = vrot.lane.b32.xlu1 %v591_v42, %s663_s0 }
 0x103   :  { %v593_v43 = vpop.eup %592 }
 0x104   :  { %229 = vrot.lane.b32.xlu0 %v593_v43, %s663_s0  ;;  %v595_v48 = vpop.eup %594 }
 0x105   :  { %v182_v50 = vadd.f32 1.0, %v595_v48  ;;  %v597_v51 = vpop.eup %596 }
 0x106   :  { %v183_v53 = vadd.f32 1.0, %v597_v51  ;;  %v599_v54 = vpop.eup %598 }
 0x107   :  { %604 = vrcp.f32 %v182_v50  ;;  %v184_v56 = vadd.f32 1.0, %v599_v54  ;;  %v601_v57 = vpop.eup %600 }
 0x108   :  { %606 = vpow2.f32 %v469_v52  ;;  %v185_v58 = vadd.f32 1.0, %v601_v57  ;;  %v603_v59 = vpop.eup %602  ;;  %v471_v57 = vld [vmem:[%s819_s4] ss:$0 sm:$0xff]  ;;  %s666_s4 = smov [#allocation2]  }
 0x109   :  { %608 = vrcp.f32 %v183_v53  ;;  %v186_v63 = vadd.f32 1.0, %v603_v59  ;;  %s445_s26 = sshll.u32 %s666_s4, 4  ;;  %s446_s26 = int_to_ptr.vmem [resolvable:$true] %s445_s26 }
 0x10a   :  { %610 = vpow2.f32 %v470_v55  ;;  %s636_s27 = scalar_lea.vmem %s446_s26, 896  ;;  %p641_p1 = scmp.lt.s32.totalorder %s446_s26, %s446_s26 }
 0x10b   :  { %612 = vrcp.f32 %v184_v56  ;;  %p637_p0 = scmp.ne.s32.totalorder %s446_s26, %s636_s27  ;;  %p642_p2 = scmp.lt.s32.totalorder %s636_s27, %s636_s27 }
 0x10c   :  { %614 = vrcp.f32 %v185_v58 }
 0x10d   :  { %p643_p3 = por %p642_p2, %p641_p1 }
 0x10f   :  { %p644_p4 = pnand %p643_p3, %p637_p0 }
 0x111   :  { %v605_v60 = vpop.eup %604 }
 0x112   :  { %v607_v0 = vpop.eup %606 }
 0x113   :  { %v609_v1 = vpop.eup %608  ;;  %v187_v5 = vadd.f32 1.0, %v607_v0 }
 0x114   :  { %v611_v7 = vpop.eup %610 }
 0x115   :  { %v613_v8 = vpop.eup %612  ;;  %v188_v11 = vadd.f32 1.0, %v611_v7 }
 0x116   :  { %v615_v12 = vpop.eup %614 }
 0x15e   :  { %v218_v61 = vpop.permute.xlu0 %217 }
 0x15f   :  { %v238_v62 = vmul.f32 %v605_v60, %v218_v61 }
 0x161   :  { %616 = vtanh.f32 %v238_v62 }
 0x162   :  { %v220_v2 = vpop.permute.xlu0 %219  ;;  %618 = vrcp.f32 %v186_v63 }
 0x163   :  { %v239_v4 = vmul.f32 %v609_v1, %v220_v2 }
 0x165   :  { %620 = vtanh.f32 %v239_v4 }
 0x166   :  { %v222_v9 = vpop.permute.xlu1 %221  ;;  %622 = vrcp.f32 %v187_v5 }
 0x167   :  { %v240_v10 = vmul.f32 %v613_v8, %v222_v9 }
 0x169   :  { %624 = vtanh.f32 %v240_v10 }
 0x16a   :  { %v224_v13 = vpop.permute.xlu1 %223  ;;  %626 = vrcp.f32 %v188_v11 }
 0x16b   :  { %v617_v14 = vpop.eup %616  ;;  %v241_v15 = vmul.f32 %v615_v12, %v224_v13 }
 0x16c   :  { %259 = vrot.lane.b32.xlu1 %v617_v14, %s664_s2  ;;  %v619_v16 = vpop.eup %618 }
 0x16d   :  { %628 = vtanh.f32 %v241_v15 }
 0x16e   :  { %v226_v17 = vpop.permute.xlu0 %225 }
 0x16f   :  { %v621_v18 = vpop.eup %620  ;;  %v242_v19 = vmul.f32 %v619_v16, %v226_v17 }
 0x170   :  { %261 = vrot.lane.b32.xlu0 %v621_v18, %s664_s2  ;;  %v623_v20 = vpop.eup %622 }
 0x171   :  { %630 = vtanh.f32 %v242_v19 }
 0x172   :  { %v228_v21 = vpop.permute.xlu1 %227 }
 0x173   :  { %v625_v22 = vpop.eup %624  ;;  %v243_v23 = vmul.f32 %v623_v20, %v228_v21 }
 0x174   :  { %263 = vrot.lane.b32.xlu1 %v625_v22, %s664_s2  ;;  %v627_v24 = vpop.eup %626 }
 0x175   :  { %632 = vtanh.f32 %v243_v23 }
 0x176   :  { %v230_v25 = vpop.permute.xlu0 %229 }
 0x177   :  { %v629_v26 = vpop.eup %628  ;;  %v244_v27 = vmul.f32 %v627_v24, %v230_v25 }
 0x178   :  { %265 = vrot.lane.b32.xlu0 %v629_v26, %s664_s2 }
 0x179   :  { %634 = vtanh.f32 %v244_v27 }
 0x17b   :  { %v631_v33 = vpop.eup %630 }
 0x17c   :  { %267 = vrot.lane.b32.xlu1 %v631_v33, %s664_s2 }
 0x17f   :  { %v633_v35 = vpop.eup %632 }
 0x180   :  { %269 = vrot.lane.b32.xlu0 %v633_v35, %s664_s2 }
 0x183   :  { %v635_v36 = vpop.eup %634 }
 0x184   :  { %271 = vrot.lane.b32.xlu1 %v635_v36, %s664_s2 }
 0x1de   :  { %v260_v37 = vpop.permute.xlu1 %259 }
 0x1df   :  { %v280_v38 = vmul.f32 %v605_v60, %v260_v37 }
 0x1e1   :  { %305 = vrot.lane.b32.xlu0 %v280_v38, %s665_s24 }
 0x1e2   :  { %v262_v39 = vpop.permute.xlu0 %261 }
 0x1e3   :  { %v281_v40 = vmul.f32 %v609_v1, %v262_v39 }
 0x1e5   :  { %307 = vrot.lane.b32.xlu1 %v281_v40, %s665_s24 }
 0x1e6   :  { %v264_v41 = vpop.permute.xlu1 %263 }
 0x1e7   :  { %v282_v42 = vmul.f32 %v613_v8, %v264_v41 }
 0x1e9   :  { %309 = vrot.lane.b32.xlu0 %v282_v42, %s665_s24 }
 0x1ea   :  { %v266_v43 = vpop.permute.xlu0 %265 }
 0x1eb   :  { %v283_v44 = vmul.f32 %v615_v12, %v266_v43 }
 0x1ed   :  { %311 = vrot.lane.b32.xlu1 %v283_v44, %s665_s24 }
 0x1ee   :  { %v268_v3 = vpop.permute.xlu1 %267 }
 0x1ef   :  { %v284_v45 = vmul.f32 %v619_v16, %v268_v3 }
 0x1f1   :  { %313 = vrot.lane.b32.xlu0 %v284_v45, %s665_s24 }
 0x1f2   :  { %v270_v46 = vpop.permute.xlu0 %269 }
 0x1f3   :  { %v285_v47 = vmul.f32 %v623_v20, %v270_v46 }
 0x1f5   :  { %315 = vrot.lane.b32.xlu1 %v285_v47, %s665_s24 }
 0x1f6   :  { %v272_v48 = vpop.permute.xlu1 %271 }
 0x1f7   :  { %v286_v49 = vmul.f32 %v627_v24, %v272_v48 }
 0x1f9   :  { %317 = vrot.lane.b32.xlu0 %v286_v49, %s665_s24 }
 0x253   :  { %v306_v50 = vpop.permute.xlu0 %305 }
 0x254   :  { %539 = vmatmul.mubr.msk.f32.vlgmr.msra.gmra.mrb[0].mxu1 %vm39_vm1, %v306_v50 }
 0x255   :  { %541 = vmatprep.mubr.msk.f32.mxu1 %vm661_vm0, %v662_v6 }
 0x257   :  { %v308_v51 = vpop.permute.xlu1 %307 }
 0x258   :  { %542 = vmatmul.mubr.msk.f32.gmra.mrb[2].mxu1 %vm39_vm1, %v308_v51 }
 0x259   :  { %544 = vmatprep.mubr.msk.f32.mxu1 %vm661_vm0, %v662_v6 }
 0x25b   :  { %v310_v52 = vpop.permute.xlu0 %309 }
 0x25c   :  { %545 = vmatmul.mubr.msk.f32.gmra.mrb[4].mxu1 %vm39_vm1, %v310_v52 }
 0x25d   :  { %547 = vmatprep.mubr.msk.f32.mxu1 %vm661_vm0, %v662_v6 }
 0x25f   :  { %v312_v53 = vpop.permute.xlu1 %311 }
 0x260   :  { %548 = vmatmul.mubr.msk.f32.gmra.mrb[6].mxu1 %vm39_vm1, %v312_v53 }
 0x261   :  { %550 = vmatprep.mubr.msk.f32.mxu1 %vm661_vm0, %v662_v6 }
 0x263   :  { %v314_v54 = vpop.permute.xlu0 %313 }
 0x264   :  { %551 = vmatmul.mubr.msk.f32.gmra.mrb[8].mxu1 %vm39_vm1, %v314_v54 }
 0x265   :  { %553 = vmatprep.mubr.msk.f32.mxu1 %vm661_vm0, %v662_v6 }
 0x267   :  { %v316_v55 = vpop.permute.xlu1 %315 }
 0x268   :  { %554 = vmatmul.mubr.msk.f32.gmra.mrb[10].mxu1 %vm39_vm1, %v316_v55 }
 0x269   :  { %556 = vmatprep.mubr.msk.f32.mxu1 %vm661_vm0, %v662_v6 }
 0x26b   :  { %v318_v56 = vpop.permute.xlu0 %317 }
 0x26c   :  { %557 = vmatmul.mubr.msk.f32.gmra.mrb[12].mxu1 %vm39_vm1, %v318_v56 }
 0x327   :  { %v399_v58 = vpop.f32.mrb[0].mxu1 }
 0x328   :  { %v400_v59 = vadd.f32 %v471_v57, %v399_v58  ;;  %v540_v60 = vpop.f32.mrb[1].mxu1 }
 0x32a   :  { %433 = vst [vmem:[#allocation2] sm:$0xff] %v400_v59 }
 0x32b   :  { %v404_v61 = vpop.f32.mrb[2].mxu1 }
 0x32c   :  { %v405_v62 = vadd.f32 %v471_v57, %v404_v61  ;;  %v543_v63 = vpop.f32.mrb[3].mxu1 }
 0x32e   :  { %434 = vst [vmem:[#allocation2 + $0x8] sm:$0xff] %v405_v62 }
 0x32f   :  { %v409_v0 = vpop.f32.mrb[4].mxu1 }
 0x330   :  { %v410_v1 = vadd.f32 %v471_v57, %v409_v0  ;;  %v546_v2 = vpop.f32.mrb[5].mxu1 }
 0x332   :  { %435 = vst [vmem:[#allocation2 + $0x10] sm:$0xff] %v410_v1 }
 0x333   :  { %v414_v6 = vpop.f32.mrb[6].mxu1 }
 0x334   :  { %v415_v4 = vadd.f32 %v471_v57, %v414_v6  ;;  %v549_v5 = vpop.f32.mrb[7].mxu1 }
 0x336   :  { %436 = vst [vmem:[#allocation2 + $0x18] sm:$0xff] %v415_v4 }
 0x337   :  { %v419_v7 = vpop.f32.mrb[8].mxu1 }
 0x338   :  { %v420_v8 = vadd.f32 %v471_v57, %v419_v7  ;;  %v552_v9 = vpop.f32.mrb[9].mxu1 }
 0x33a   :  { %437 = vst [vmem:[#allocation2 + $0x20] sm:$0xff] %v420_v8 }
 0x33b   :  { %v424_v10 = vpop.f32.mrb[10].mxu1 }
 0x33c   :  { %v425_v11 = vadd.f32 %v471_v57, %v424_v10  ;;  %v555_v12 = vpop.f32.mrb[11].mxu1 }
 0x33e   :  { %438 = vst [vmem:[#allocation2 + $0x28] sm:$0xff] %v425_v11 }
 0x33f   :  { %v429_v13 = vpop.f32.mrb[12].mxu1 }
 0x340   :  { %v430_v14 = vadd.f32 %v471_v57, %v429_v13  ;;  %v558_v15 = vpop.f32.mrb[13].mxu1 }
 0x342   :  { %439 = vst [vmem:[#allocation2 + $0x30] sm:$0xff] %v430_v14 }
 0x343   :  { %647 = shalt.err (!%p644_p4)
}
 0x344   :  { %s648_s29 = scalar_lea.hbm %s820_s5, 896 }
 0x345   :  { %p649_p5 = scmp.ne.s32.totalorder %s820_s5, %s648_s29  ;;  %p652_p6 = scmp.lt.u32.totalorder %s648_s29, %s820_s5 }
 0x347   :  { %p654_p7 = pnand %p652_p6, %p649_p5 }
 0x349   :  { %657 = shalt.err (!%p654_p7)
}
 0x34a   :  { %s667_s9 = smov 128   ;;  %s668_s10 = smov 8  }
 0x34b   :  { %451 = dma.vmem_to_hbm [thread:$0]  %s446_s26, 896, %s820_s5, [#allocation3], %s667_s9, %s667_s9, %s668_s10  }
 0x34c   :  { %658 = dma.done.wait [#allocation3], 896  }
 0x34d   :  { %659 = vsyncadd [#allocation3], 4294966400 }
 0x34e   :  { %455 = vsyncpa [#allocation3], 1 }

</bundles_post_ra>
